<compile_context>
chip_gen: v5e
topology: v5e:2x2
jax: 0.10.0
libtpu: 0.0.40
codegen_flags: <defaults>
</compile_context>

<pallas_src>
import functools

import jax
import jax.numpy as jnp
from jax.experimental import pallas as pl
from jax.experimental.pallas import tpu as pltpu


_INPUT_TILE_BYTES = 4 * 1024 * 1024   # per-input, per-buffer VMEM budget (v7x-sized tiles)
_VMEM_LIMIT = 48 * 1024 * 1024        # double-buffers + in-kernel intermediates headroom
_LANE_WIDTHS = (512, 256, 128)        # preferred lane-dense flatten widths


def _round_up(a, b):
    return ((a + b - 1) // b) * b


def _choose_tile_rows(rows, bytes_per_row, budget_bytes):
    """Rows per tile from a VMEM byte budget; full extent if everything fits."""
    t = max(8, (budget_bytes // max(bytes_per_row, 1)) // 8 * 8)
    if t >= rows:
        return rows          # single full-extent block: any row count is legal
    return t                 # multiple of 8 -> legal block second-minor dim


def _split_grid(rows, tile_rows):
    """(num_splits, steps, total_blocks); split across 2 TCs when >= 2 tiles."""
    total_blocks = -(-rows // tile_rows)
    num_splits = 2 if total_blocks >= 2 else 1
    steps = -(-total_blocks // num_splits)
    return num_splits, steps, total_blocks


# --------------------------------------------------------------------------
# Kernels
# --------------------------------------------------------------------------
def _mse_same_kernel(x_ref, t_ref, out_ref, acc_ref, *,
                     tile_rows, n_rows, steps, inv_count, need_mask):
    """Streaming sum of (x - t)^2 over a (splits, steps) row grid."""
    step = pl.program_id(1)

    @pl.when(step == 0)
    def _():
        acc_ref[...] = jnp.zeros_like(acc_ref)

    d = x_ref[...].astype(jnp.float32) - t_ref[...].astype(jnp.float32)
    if need_mask:
        # Rows at/after n_rows belong to a partial boundary tile (or a clamped
        # duplicate tile) -> zero them before squaring (masks out any garbage
        # padding, including NaN/Inf).  Iota + select are free VPU filler.
        block = pl.program_id(0) * steps + step
        rows_left = n_rows - block * tile_rows
        row_id = jax.lax.broadcasted_iota(jnp.int32, d.shape, 0)
        d = jnp.where(row_id < rows_left, d, 0.0)
    # Partial sublane reduction into a tiny (1, C) accumulator: keeps VMEM for
    # the input double-buffers instead of a tile-shaped accumulator RMW.
    acc_ref[...] += jnp.sum(d * d, axis=0, keepdims=True)

    @pl.when(step == pl.num_programs(1) - 1)
    def _():
        out_ref[0, 0] = jnp.sum(acc_ref[...]) * jnp.float32(inv_count)


def _mse_onehot_kernel(x_ref, idx_ref, out_ref, acc_ref, *,
                       thresh, inv_count, tile_rows, n_rows, steps, need_mask):
    """Streaming sum of (x - thresh*one_hot(idx))^2; one-hot built in-kernel."""
    step = pl.program_id(1)

    @pl.when(step == 0)
    def _():
        acc_ref[...] = jnp.zeros_like(acc_ref)

    x = x_ref[...].astype(jnp.float32)
    n, c = x.shape
    # Regenerated per step, but tiles are sized so the grid is 1-2 steps for
    # realistic (N, C); negligible VPU filler (review item acknowledged).
    cls = jax.lax.broadcasted_iota(jnp.int32, (n, c), 1)
    onehot = jnp.where(cls == idx_ref[...], jnp.float32(thresh), jnp.float32(0.0))
    d = x - onehot
    if need_mask:
        block = pl.program_id(0) * steps + step
        rows_left = n_rows - block * tile_rows
        row_id = jax.lax.broadcasted_iota(jnp.int32, (n, c), 0)
        d = jnp.where(row_id < rows_left, d, 0.0)
    acc_ref[...] += jnp.sum(d * d, axis=0, keepdims=True)

    @pl.when(step == pl.num_programs(1) - 1)
    def _():
        out_ref[0, 0] = jnp.sum(acc_ref[...]) * jnp.float32(inv_count)


# --------------------------------------------------------------------------
# Wrappers
# --------------------------------------------------------------------------
def _mse_same(x, target, *, input_tile_bytes=_INPUT_TILE_BYTES):
    n_elems = x.size
    # Free row-major 2-D view: lane-dense width when it divides the element
    # count, otherwise the natural last dim (block spans the full last dim,
    # which is always legal).  No jnp.pad -> no extra HBM read/write pass.
    cols = None
    for w in _LANE_WIDTHS:
        if n_elems % w == 0:
            cols = w
            break
    if cols is None:
        cols = int(x.shape[-1]) if x.ndim >= 1 else 1
    rows = n_elems // cols
    xv = x.reshape(rows, cols)
    tv = target.reshape(rows, cols)

    # TODO(synk): a huge, non-128-divisible last dim (e.g. a prime-length 1-D
    # input) lands in one (rows, cols) block; add a column-tiled variant if
    # that ever exceeds VMEM.
    lane_pad_cols = _round_up(cols, 128)
    tile_rows = _choose_tile_rows(rows, lane_pad_cols * 4, input_tile_bytes)
    num_splits, steps, total_blocks = _split_grid(rows, tile_rows)
    need_mask = (rows % tile_rows != 0) or (num_splits * steps != total_blocks)
    last_block = total_blocks - 1

    def row_map(s, i):
        # Clamp so a fully out-of-range duplicate tile (odd tile count split
        # over 2 cores) re-reads the last real tile; the kernel masks it to 0.
        return (jnp.minimum(s * steps + i, last_block), 0)

    kernel = functools.partial(
        _mse_same_kernel, tile_rows=tile_rows, n_rows=rows, steps=steps,
        inv_count=1.0 / float(n_elems), need_mask=need_mask)

    per_split = pl.pallas_call(
        kernel,
        out_shape=jax.ShapeDtypeStruct((num_splits, 1), jnp.float32),
        grid=(num_splits, steps),
        in_specs=[pl.BlockSpec((tile_rows, cols), row_map),
                  pl.BlockSpec((tile_rows, cols), row_map)],
        out_specs=pl.BlockSpec((1, 1), lambda s, i: (s, 0),
                               memory_space=pltpu.MemorySpace.SMEM),
        scratch_shapes=[pltpu.VMEM((1, cols), jnp.float32)],
        compiler_params=pltpu.CompilerParams(
            dimension_semantics=("parallel", "arbitrary"),
            vmem_limit_bytes=_VMEM_LIMIT),
        cost_estimate=pl.CostEstimate(
            flops=4 * n_elems,
            transcendentals=0,
            bytes_accessed=(x.dtype.itemsize + target.dtype.itemsize) * n_elems
                           + 4 * num_splits),
    )(xv, tv)
    return jnp.sum(per_split)


def _mse_onehot(x, target, thresh, *, input_tile_bytes=_INPUT_TILE_BYTES):
    assert x.ndim == 2, "index-target path expects x of shape (N, C)"
    n, c = x.shape
    idx = target.reshape(-1, 1).astype(jnp.int32)   # tiny (N, 1) cast at most

    # Budget accounts for the lane-padded (tile_rows, 1) index column in VMEM.
    # TODO(synk): for tiny class counts (C <= 64) a k=128//C row->lane fold
    # would restore lane density; skipped (perf-only, grid is already 1-2 steps).
    bytes_per_row = (_round_up(c, 128) + 128) * 4
    tile_rows = _choose_tile_rows(n, bytes_per_row, input_tile_bytes)
    num_splits, steps, total_blocks = _split_grid(n, tile_rows)
    need_mask = (n % tile_rows != 0) or (num_splits * steps != total_blocks)
    last_block = total_blocks - 1

    def row_map(s, i):
        return (jnp.minimum(s * steps + i, last_block), 0)

    kernel = functools.partial(
        _mse_onehot_kernel, thresh=float(thresh),
        inv_count=1.0 / float(n * c), tile_rows=tile_rows, n_rows=n,
        steps=steps, need_mask=need_mask)

    per_split = pl.pallas_call(
        kernel,
        out_shape=jax.ShapeDtypeStruct((num_splits, 1), jnp.float32),
        grid=(num_splits, steps),
        in_specs=[pl.BlockSpec((tile_rows, c), row_map),
                  pl.BlockSpec((tile_rows, 1), row_map)],
        out_specs=pl.BlockSpec((1, 1), lambda s, i: (s, 0),
                               memory_space=pltpu.MemorySpace.SMEM),
        scratch_shapes=[pltpu.VMEM((1, c), jnp.float32)],
        compiler_params=pltpu.CompilerParams(
            dimension_semantics=("parallel", "arbitrary"),
            vmem_limit_bytes=_VMEM_LIMIT),
        cost_estimate=pl.CostEstimate(
            flops=6 * n * c,
            transcendentals=0,
            bytes_accessed=x.dtype.itemsize * n * c + 4 * n + 4 * num_splits),
    )(x, idx)
    return jnp.sum(per_split)


def unilateral_mse(x, target, thresh=1.0, *, input_tile_bytes=_INPUT_TILE_BYTES):
    """Pallas implementation of UnilateralMse.forward.

    NOTE: the reference's `torch.clip(x, max=thresh)` is not in-place and its
    result is discarded, so it is a no-op and is faithfully NOT applied here.
    """
    if x.shape == target.shape:
        return _mse_same(x, target, input_tile_bytes=input_tile_bytes)
    return _mse_onehot(x, target, thresh, input_tile_bytes=input_tile_bytes)


# --------------------------------------------------------------------------
# Self-test
# --------------------------------------------------------------------------
if __name__ == "__main__":
    key = jax.random.PRNGKey(0)
    keys = jax.random.split(key, 12)
    thresh = 1.0

    def ref_same(a, b):
        return jnp.mean((a.astype(jnp.float32) - b.astype(jnp.float32)) ** 2)

    def ref_onehot(a, idx, c):
        oh = jax.nn.one_hot(idx, c, dtype=jnp.float32) * thresh
        return jnp.mean((a.astype(jnp.float32) - oh) ** 2)

    # 1) Small same-shape dense fire-rate targets (module-typical SNN output).
    x1 = jax.random.uniform(keys[0], (2, 4, 32), dtype=jnp.float32) * 1.5
    t1 = jax.random.uniform(keys[1], (2, 4, 32), dtype=jnp.float32)
    o1 = jax.block_until_ready(unilateral_mse(x1, t1, thresh))
    assert jnp.allclose(o1, ref_same(x1, t1), rtol=1e-5, atol=1e-6), o1

    # 2) Small class-index targets -> thresh * one_hot.
    x2 = jax.random.uniform(keys[2], (8, 16), dtype=jnp.float32) * 1.5
    t2 = jnp.arange(8, dtype=jnp.int32) % 16
    o2 = jax.block_until_ready(unilateral_mse(x2, t2, thresh))
    assert jnp.allclose(o2, ref_onehot(x2, t2, 16), rtol=1e-5, atol=1e-6), o2

    # 3) Same-shape, lane-dense path with default (large) tiles.
    x3 = jax.random.uniform(keys[3], (8, 256, 512), dtype=jnp.float32)
    t3 = jax.random.uniform(keys[4], (8, 256, 512), dtype=jnp.float32)
    o3 = jax.block_until_ready(unilateral_mse(x3, t3, thresh))
    assert jnp.allclose(o3, ref_same(x3, t3), rtol=1e-4, atol=1e-6), o3

    # 4) Same-shape, small tile budget -> multi-tile + 2-way split + partial
    #    boundary block + clamped duplicate block (odd tile count).
    x4 = jax.random.uniform(keys[5], (40, 512), dtype=jnp.float32)
    t4 = jax.random.uniform(keys[6], (40, 512), dtype=jnp.float32)
    o4 = jax.block_until_ready(
        unilateral_mse(x4, t4, thresh, input_tile_bytes=32 * 1024))
    assert jnp.allclose(o4, ref_same(x4, t4), rtol=1e-5, atol=1e-6), o4

    # 5) Same-shape, natural non-128-aligned last dim, row count not a
    #    multiple of 8 (full-extent block, no padding anywhere).
    x5 = jax.random.uniform(keys[7], (37, 10), dtype=jnp.float32)
    t5 = jax.random.uniform(keys[8], (37, 10), dtype=jnp.float32)
    o5 = jax.block_until_ready(unilateral_mse(x5, t5, thresh))
    assert jnp.allclose(o5, ref_same(x5, t5), rtol=1e-5, atol=1e-6), o5

    # 6) Same-shape bf16 inputs (f32 cast happens in-kernel).
    x6 = jax.random.uniform(keys[9], (16, 256), dtype=jnp.float32).astype(jnp.bfloat16)
    t6 = jax.random.uniform(keys[10], (16, 256), dtype=jnp.float32).astype(jnp.bfloat16)
    o6 = jax.block_until_ready(unilateral_mse(x6, t6, thresh))
    assert jnp.allclose(o6, ref_same(x6, t6), rtol=1e-4, atol=1e-6), o6

    # 7) One-hot path, non-multiple-of-8 rows, small tile budget -> multi-tile
    #    + split + boundary masking + clamped duplicate block.
    x7 = jax.random.uniform(keys[11], (100, 16), dtype=jnp.float32) * 1.5
    t7 = jnp.arange(100, dtype=jnp.int32) % 16
    o7 = jax.block_until_ready(
        unilateral_mse(x7, t7, thresh, input_tile_bytes=8 * 1024))
    assert jnp.allclose(o7, ref_onehot(x7, t7, 16), rtol=1e-5, atol=1e-6), o7

    print("KERNEL_OK")
</pallas_src>

<mosaic_0001>
module attributes {stable_mosaic.version = 11 : i64} {
  func.func @_mse_same_kernel(%arg0: i32, %arg1: i32, %arg2: memref<1x256xf32, #tpu.memory_space<vmem>>, %arg3: memref<1x256xf32, #tpu.memory_space<vmem>>, %arg4: memref<1x1xf32, #tpu.memory_space<smem>>, %arg5: memref<1x256xf32, #tpu.memory_space<vmem>>) attributes {dimension_semantics = [#tpu.dimension_semantics<parallel>, #tpu.dimension_semantics<arbitrary>], iteration_bounds = array<i64: 1, 1>, scalar_prefetch = 0 : i64, scratch_operands = 1 : i64, tpu.core_type = #tpu.core_type<tc>, window_params = [{transform_indices = @transform_0, window_bounds = array<i64: 1, 256>}, {transform_indices = @transform_1, window_bounds = array<i64: 1, 256>}, {transform_indices = @transform_2, window_bounds = array<i64: 1, 1>}]} {
    %c0_i32 = arith.constant 0 : i32
    %0 = arith.cmpi eq, %arg1, %c0_i32 : i32
    %1 = arith.extui %0 : i1 to i32
    %c0_i32_0 = arith.constant 0 : i32
    %2 = arith.cmpi ne, %1, %c0_i32_0 : i32
    scf.if %2 {
      %cst_10 = arith.constant 0.000000e+00 : f32
      %15 = vector.broadcast %cst_10 : f32 to vector<1x256xf32>
      %c0_11 = arith.constant 0 : index
      %c0_12 = arith.constant 0 : index
      %16 = vector.load %arg5[%c0_11, %c0_12] : memref<1x256xf32, #tpu.memory_space<vmem>>, vector<1x256xf32>
      tpu.vector_store %arg5[%c0_11, %c0_12], %15 {strides = array<i32>} : memref<1x256xf32, #tpu.memory_space<vmem>>, vector<1x256xf32>,
    } else {
    }
    %c0 = arith.constant 0 : index
    %c0_1 = arith.constant 0 : index
    %3 = vector.load %arg2[%c0, %c0_1] : memref<1x256xf32, #tpu.memory_space<vmem>>, vector<1x256xf32>
    %c0_2 = arith.constant 0 : index
    %c0_3 = arith.constant 0 : index
    %4 = vector.load %arg3[%c0_2, %c0_3] : memref<1x256xf32, #tpu.memory_space<vmem>>, vector<1x256xf32>
    %5 = arith.subf %3, %4 : vector<1x256xf32>
    %c0_4 = arith.constant 0 : index
    %c0_5 = arith.constant 0 : index
    %6 = vector.load %arg5[%c0_4, %c0_5] : memref<1x256xf32, #tpu.memory_space<vmem>>, vector<1x256xf32>
    %7 = arith.mulf %5, %5 : vector<1x256xf32>
    %cst = arith.constant dense<0.000000e+00> : vector<256xf32>
    %8 = vector.multi_reduction <add>, %7, %cst [0] : vector<1x256xf32> to vector<256xf32>
    %9 = vector.shape_cast %8 : vector<256xf32> to vector<1x256xf32>
    %10 = arith.addf %6, %9 : vector<1x256xf32>
    %c0_6 = arith.constant 0 : index
    %c0_7 = arith.constant 0 : index
    %11 = vector.load %arg5[%c0_6, %c0_7] : memref<1x256xf32, #tpu.memory_space<vmem>>, vector<1x256xf32>
    tpu.vector_store %arg5[%c0_6, %c0_7], %10 {strides = array<i32>} : memref<1x256xf32, #tpu.memory_space<vmem>>, vector<1x256xf32>,
    %c0_i32_8 = arith.constant 0 : i32
    %12 = arith.cmpi eq, %arg1, %c0_i32_8 : i32
    %13 = arith.extui %12 : i1 to i32
    %c0_i32_9 = arith.constant 0 : i32
    %14 = arith.cmpi ne, %13, %c0_i32_9 : i32
    scf.if %14 {
      %c0_10 = arith.constant 0 : index
      %c0_11 = arith.constant 0 : index
      %15 = vector.load %arg5[%c0_10, %c0_11] : memref<1x256xf32, #tpu.memory_space<vmem>>, vector<1x256xf32>
      %16 = vector.shape_cast %15 : vector<1x256xf32> to vector<1x1x256xf32>
      %cst_12 = arith.constant dense<0.000000e+00> : vector<1xf32>
      %17 = vector.multi_reduction <add>, %16, %cst_12 [1, 2] : vector<1x1x256xf32> to vector<1xf32>
      %18 = vector.shape_cast %17 : vector<1xf32> to vector<1x1x1xf32>
      %19 = vector.extract %18[0, 0, 0] : f32 from vector<1x1x1xf32>
      %cst_13 = arith.constant 3.906250e-03 : f32
      %20 = arith.mulf %19, %cst_13 : f32
      %c0_14 = arith.constant 0 : index
      %c0_15 = arith.constant 0 : index
      %21 = memref.load %arg4[%c0_14, %c0_15] : memref<1x1xf32, #tpu.memory_space<smem>>
      memref.store %20, %arg4[%c0_14, %c0_15] : memref<1x1xf32, #tpu.memory_space<smem>>
    } else {
    }
    return
  }
  func.func @transform_0(%arg0: i32, %arg1: i32) -> (i32, i32) {
    %c1_i32 = arith.constant 1 : i32
    %0 = arith.muli %arg0, %c1_i32 : i32
    %1 = arith.addi %0, %arg1 : i32
    %c0_i32 = arith.constant 0 : i32
    %2 = arith.minsi %1, %c0_i32 : i32
    %c0_i32_0 = arith.constant 0 : i32
    %c0_i32_1 = arith.constant 0 : i32
    return %2, %c0_i32_0 : i32, i32
  }
  func.func @transform_1(%arg0: i32, %arg1: i32) -> (i32, i32) {
    %c1_i32 = arith.constant 1 : i32
    %0 = arith.muli %arg0, %c1_i32 : i32
    %1 = arith.addi %0, %arg1 : i32
    %c0_i32 = arith.constant 0 : i32
    %2 = arith.minsi %1, %c0_i32 : i32
    %c0_i32_0 = arith.constant 0 : i32
    %c0_i32_1 = arith.constant 0 : i32
    return %2, %c0_i32_0 : i32, i32
  }
  func.func @transform_2(%arg0: i32, %arg1: i32) -> (i32, i32) {
    %c0_i32 = arith.constant 0 : i32
    %c0_i32_0 = arith.constant 0 : i32
    return %arg0, %c0_i32 : i32, i32
  }
}

</mosaic_0001>

<bundles_post_ra>
// kernel: tpu_custom_call.1
= control target key start
LH: loop header
LB: loop body
LE: loop exit
PB: predicated region body
PF: predicated region fallthrough
CT: control target
= control target key end

     0   :  { %7 = vsyncpa [#allocation4], 0  ;;  %s223_s0 = inlined_call_operand.hbm [shape: f32[1,256], index: 0, kind: input, shape index: {}]   ;;  %s224_s1 = inlined_call_operand.hbm [shape: f32[1,256], index: 1, kind: input, shape index: {}]   ;;  %s225_s2 = inlined_call_operand.hbm [shape: f32[1,1], index: 2, kind: output, shape index: {}]  }
   0x1   :  { %8 = vsyncpa [#allocation7], 0 }
   0x2   :  { %9 = vsyncpa [#allocation5], 0  ;;  %s20_s11 = sshll.u32 %s223_s0, 4  ;;  %s195_s12 = smov [#allocation3]   ;;  %s21_s11 = int_to_ptr.hbm [resolvable:$true] %s20_s11 }
   0x3   :  { %s22_s13 = sshll.u32 %s195_s12, 4  ;;  %s36_s16 = sshll.u32 %s224_s1, 4  ;;  %s23_s13 = int_to_ptr.vmem [resolvable:$true] %s22_s13  ;;  %s37_s16 = int_to_ptr.hbm [resolvable:$true] %s36_s16 }
   0x4   :  { %25 = dma.hbm_to_vmem [thread:$0]  %s21_s11, 32, %s23_s13, [#allocation4]  }
   0x5   :  { %s196_s17 = smov [#allocation6]  }
   0x6   :  { %s38_s18 = sshll.u32 %s196_s17, 4  ;;  %s39_s18 = int_to_ptr.vmem [resolvable:$true] %s38_s18 }
   0x7   :  { %41 = dma.hbm_to_vmem [thread:$0]  %s37_s16, 32, %s39_s18, [#allocation7]  }
   0x8   :  { %189 = dma.done.wait [#allocation4], 32  }
   0x9   :  { %190 = vsyncadd [#allocation4], 4294967264 }
   0xa   :  { %191 = dma.done.wait [#allocation7], 32  }
   0xb   :  { %192 = vsyncadd [#allocation7], 4294967264  ;;  %v60_v0 = vlaneseq  ;;  %v197_v1 = vmov 0.0   ;;  %v65_v2 = vld [vmem:[#allocation3] sm:$0x3]  ;;  %vm86_vm1 = vcmask 1040384  }
   0xc   :  { %v66_v3 = vld [vmem:[#allocation6] sm:$0x3]  ;;  %s107_s19 = sshll.u32 %s225_s2, 4  ;;  %s198_s22 = smov [#allocation8]   ;;  %s108_s19 = int_to_ptr.hbm [resolvable:$true] %s107_s19 }
   0xd   :  { %vm62_vm0 = vcmp.lt.s32.totalorder %v60_v0, 256  ;;  %v67_v4 = vsub.f32 %v65_v2, %v66_v3 }
   0xe   :  { %64 = vst.msk [vmem:[#allocation2] sm:$0x3] %vm62_vm0, %v197_v1 }
   0xf   :  { %v69_v6 = vmul.f32 %v67_v4, %v67_v4 }
  0x15   :  { %v68_v5 = vld [vmem:[#allocation2] sm:$0x3] }
  0x16   :  { %v71_v7 = vadd.f32 %v69_v6, %v68_v5 }
  0x18   :  { %76 = vst.msk [vmem:[#allocation2] sm:$0x3] %vm62_vm0, %v71_v7 }
  0x1f   :  { %v80_v8 = vld [vmem:[#allocation2] sm:$0x3] }
  0x20   :  { %v82_v9 = vperm.slane %v80_v8, 0  ;;  %v83_v10 = vperm.slane %v80_v8, 1 }
  0x22   :  { %v87_v11 = vsel %vm86_vm1, %v82_v9, 0.0  ;;  %v88_v12 = vsel %vm86_vm1, %v83_v10, 0.0 }
  0x23   :  { %v89_v13 = vadd.f32 %v88_v12, %v87_v11 }
  0x25   :  { %90 = vadd.xlane.f32.xlu0 %v89_v13 }
  0x98   :  { %v91_v14 = vpop.xlane.xlu0 %90 }
  0x99   :  { %v92_v15 = vrot.slane %v91_v14, 4 }
  0x9b   :  { %v93_v16 = vadd.f32 %v92_v15, %v91_v14 }
  0x9d   :  { %v94_v17 = vrot.slane %v93_v16, 2 }
  0x9f   :  { %v95_v18 = vadd.f32 %v94_v17, %v93_v16 }
  0xa1   :  { %v96_v19 = vrot.slane %v95_v18, 1 }
  0xa3   :  { %v97_v20 = vadd.f32 %v96_v19, %v95_v18 }
  0xa5   :  { %123 = vpush %v97_v20 }
  0xd6   :  { %s124_s20 = spop %123 }
  0xd7   :  { %s99_s21 = smul.f32 0.00390625, %s124_s20 }
  0xd9   :  { %101 = sst [smem:[#allocation8]] %s99_s21 }
  0xda   :  { %110 = dma.smem_to_hbm %s198_s22, 16, %s108_s19, [#allocation5]  }
  0xdb   :  { %193 = dma.done.wait [#allocation5], 16  }
  0xdc   :  { %194 = vsyncadd [#allocation5], 4294967280 }
  0xdd   :  { %115 = sfence }
  0xde   :  { %116 = vsyncpa [#allocation4], 1 }
  0xdf   :  { %117 = vsyncpa [#allocation7], 1 }
  0xe0   :  { %118 = vsyncpa [#allocation5], 1 }

</bundles_post_ra>
